<compile_context>
chip_gen: v6e
topology: v6e:2x2x1
jax: 0.10.0
libtpu: 0.0.40
codegen_flags: <defaults>
</compile_context>

<pallas_src>
import functools
from math import sqrt

import jax
import jax.numpy as jnp
from jax import lax
from jax.experimental import pallas as pl
from jax.experimental.pallas import tpu as pltpu

_EPS = 1e-12            # torch.nn.functional.normalize default eps
_EPS_SQ = _EPS * _EPS   # sqrt(max(ss, eps^2)) == max(sqrt(ss), eps)

# Double-buffered input + output tiles => ~4 * tm * H * itemsize bytes of VMEM.
_TILE_BUDGET_BYTES = 24 * 1024 * 1024   # keeps buffers well under v7x's 64 MiB VMEM
_VMEM_LIMIT_BYTES = 48 * 1024 * 1024    # scoped VMEM limit (headroom for intermediates)


def _row_tile(rows, h, itemsize, cap=1024):
    """Pick the largest row tile that fits the VMEM budget (sublane aligned)."""
    row_align = 16 if itemsize == 2 else 8          # bf16 packs 2 rows / sublane
    tm = _TILE_BUDGET_BYTES // (4 * h * itemsize)
    tm = max(row_align, min(cap, tm))
    tm = (tm // row_align) * row_align
    rows_aligned = pl.cdiv(rows, row_align) * row_align
    return max(row_align, min(tm, rows_aligned))


# ---------------------------------------------------------------------------
# FixNorm: out = radius * x / max(||x||_2, eps) along the last dim
# ---------------------------------------------------------------------------
def _fixnorm_kernel(x_ref, o_ref, *, radius):
    x = x_ref[...].astype(jnp.float32)
    sumsq = jnp.sum(x * x, axis=-1, keepdims=True)                 # (tm, 1)
    # Fused per-row scale: rsqrt goes to the EUP slot; radius folded in.
    scale = radius * lax.rsqrt(jnp.maximum(sumsq, _EPS_SQ))        # (tm, 1)
    o_ref[...] = (x * scale).astype(o_ref.dtype)


def fixnorm(x, radius, *, tm=None):
    """radius * F.normalize(x, dim=-1). x: (..., H), radius: Python float."""
    orig_shape = x.shape
    H = orig_shape[-1]
    rows = 1
    for d in orig_shape[:-1]:
        rows *= d
    x2d = x.reshape(rows, H)

    itemsize = jnp.dtype(x.dtype).itemsize
    if tm is None:
        tm = _row_tile(rows, H, itemsize)

    grid = (pl.cdiv(rows, tm),)   # ragged last block: reads padded, writes masked

    out2d = pl.pallas_call(
        functools.partial(_fixnorm_kernel, radius=float(radius)),
        out_shape=jax.ShapeDtypeStruct((rows, H), x.dtype),
        grid_spec=pltpu.PrefetchScalarGridSpec(
            num_scalar_prefetch=0,
            grid=grid,
            in_specs=[pl.BlockSpec((tm, H), lambda i: (i, 0))],
            out_specs=pl.BlockSpec((tm, H), lambda i: (i, 0)),
        ),
        compiler_params=pltpu.CompilerParams(
            dimension_semantics=("parallel",),
            vmem_limit_bytes=_VMEM_LIMIT_BYTES,
        ),
    )(x2d)
    return out2d.reshape(orig_shape)


# ---------------------------------------------------------------------------
# Tied output head: logits = c @ w_emb.T + out_bias
# ---------------------------------------------------------------------------
def _tied_logits_kernel(c_ref, w_ref, b_ref, o_ref):
    c = c_ref[...].astype(jnp.float32)                 # (tm, D)
    w = w_ref[...].astype(jnp.float32)                 # (V, D)
    logits = lax.dot_general(c, w, (((1,), (1,)), ((), ())),
                             preferred_element_type=jnp.float32)   # (tm, V)
    o_ref[...] = (logits + b_ref[...]).astype(o_ref.dtype)


def tied_output_projection(c, w_emb, out_bias, *, tm=None):
    """F.linear(c, w_emb, out_bias): (..., D) x (V, D) -> (..., V)."""
    orig_shape = c.shape
    D = orig_shape[-1]
    V = w_emb.shape[0]
    rows = 1
    for d in orig_shape[:-1]:
        rows *= d
    c2d = c.reshape(rows, D)
    bias2d = out_bias.reshape(1, V)

    itemsize = jnp.dtype(c.dtype).itemsize
    if tm is None:
        tm = _row_tile(rows, max(D, V), itemsize, cap=512)

    grid = (pl.cdiv(rows, tm),)

    out2d = pl.pallas_call(
        _tied_logits_kernel,
        out_shape=jax.ShapeDtypeStruct((rows, V), c.dtype),
        grid_spec=pltpu.PrefetchScalarGridSpec(
            num_scalar_prefetch=0,
            grid=grid,
            in_specs=[
                pl.BlockSpec((tm, D), lambda i: (i, 0)),   # activations (tiled rows)
                pl.BlockSpec((V, D), lambda i: (0, 0)),    # tied weights (resident)
                pl.BlockSpec((1, V), lambda i: (0, 0)),    # bias (resident)
            ],
            out_specs=pl.BlockSpec((tm, V), lambda i: (i, 0)),
        ),
        compiler_params=pltpu.CompilerParams(
            dimension_semantics=("parallel",),
            vmem_limit_bytes=_VMEM_LIMIT_BYTES,
        ),
    )(c2d, w_emb, bias2d)
    return out2d.reshape(orig_shape[:-1] + (V,))


# ---------------------------------------------------------------------------
# TransformerLM forward (fix_norm=True, add_positions=True, tied embeddings)
# ---------------------------------------------------------------------------
def transformer_lm_forward(params, tokens, *, radius, fix_norm=True,
                           add_positions=True, pad_idx=0, pos_padding_idx=0):
    b, s = tokens.shape
    word_emb = params["word_embeddings"]                       # (V, D)
    w = fixnorm(word_emb, radius) if fix_norm else word_emb

    # F.embedding forward is a plain gather (padding_idx only affects grads).
    e = jnp.take(w, tokens, axis=0)                            # (b, s, D)

    if add_positions and params.get("position_embeddings") is not None:
        positions = jnp.broadcast_to(jnp.arange(s)[None, :], (b, s))
        positions = jnp.where(tokens == pad_idx, pos_padding_idx, positions)
        e = e + jnp.take(params["position_embeddings"], positions, axis=0)

    # Causal mask that would feed the decoder stack.
    _mask = jnp.triu(jnp.ones((s, s), dtype=bool), k=1)
    # TODO(synk): TransformerEncoder (self.decoder) is not defined in the spec;
    # it is treated as identity here, so the mask is unused.
    c = e

    if fix_norm:
        c = fixnorm(c, radius)

    # Tied-embedding output head: F.linear(c, w_embeddings, out_bias)
    return tied_output_projection(c, w, params["out_bias"])


if __name__ == "__main__":
    key = jax.random.PRNGKey(0)
    batch, seq, hidden, vocab, max_length = 2, 8, 32, 64, 16
    pad_idx = 0
    radius = 1.5

    k1, k2, k3 = jax.random.split(key, 3)
    d = 0.01  # fix_norm init: uniform(-d, d)
    word_embeddings = jax.random.uniform(
        k1, (vocab, hidden), jnp.float32, minval=-d, maxval=d)
    position_embeddings = (
        jax.random.normal(k2, (max_length + 1, hidden), jnp.float32)
        * sqrt(2.0 / (2.0 * hidden)))
    out_bias = jnp.zeros((vocab,), jnp.float32)

    tokens = jax.random.randint(k3, (batch, seq), 0, vocab)
    tokens = tokens.at[:, -1].set(pad_idx)   # a couple of padding tokens

    params = {
        "word_embeddings": word_embeddings,
        "position_embeddings": position_embeddings,
        "out_bias": out_bias,
    }

    logits = transformer_lm_forward(
        params, tokens, radius=radius, fix_norm=True, add_positions=True,
        pad_idx=pad_idx, pos_padding_idx=max_length)
    logits = jax.block_until_ready(logits)

    # ----- plain-JAX reference (same semantics as the PyTorch forward) -----
    def ref_fixnorm(v):
        n = jnp.sqrt(jnp.sum(v.astype(jnp.float32) ** 2, axis=-1, keepdims=True))
        return radius * v / jnp.maximum(n, _EPS)

    w_ref = ref_fixnorm(word_embeddings)
    e_ref = w_ref[tokens]
    positions = jnp.broadcast_to(jnp.arange(seq)[None, :], (batch, seq))
    positions = jnp.where(tokens == pad_idx, max_length, positions)
    e_ref = e_ref + position_embeddings[positions]
    c_ref = ref_fixnorm(e_ref)               # decoder treated as identity (see TODO)
    logits_ref = c_ref @ w_ref.T + out_bias

    # Standalone check of the FixNorm kernel too.
    w_pallas = jax.block_until_ready(fixnorm(word_embeddings, radius))
    assert jnp.allclose(w_pallas, w_ref, atol=1e-5, rtol=1e-5)

    assert logits.shape == (batch, seq, vocab)
    assert jnp.allclose(logits, logits_ref, atol=1e-4, rtol=1e-4)

    print("KERNEL_OK")
</pallas_src>

<mosaic_0001>
module attributes {stable_mosaic.version = 11 : i64} {
  func.func @_fixnorm_kernel(%arg0: i32, %arg1: memref<64x32xf32, #tpu.memory_space<vmem>>, %arg2: memref<64x32xf32, #tpu.memory_space<vmem>>) attributes {dimension_semantics = [#tpu.dimension_semantics<parallel>], iteration_bounds = array<i64: 1>, scalar_prefetch = 0 : i64, scratch_operands = 0 : i64, tpu.core_type = #tpu.core_type<tc>, window_params = [{transform_indices = @transform_0, window_bounds = array<i64: 64, 32>}, {transform_indices = @transform_1, window_bounds = array<i64: 64, 32>}]} {
    %c0 = arith.constant 0 : index
    %c0_0 = arith.constant 0 : index
    %0 = vector.load %arg1[%c0, %c0_0] : memref<64x32xf32, #tpu.memory_space<vmem>>, vector<64x32xf32>
    %1 = arith.mulf %0, %0 : vector<64x32xf32>
    %cst = arith.constant dense<0.000000e+00> : vector<64xf32>
    %2 = vector.multi_reduction <add>, %1, %cst [1] : vector<64x32xf32> to vector<64xf32>
    %3 = vector.shape_cast %2 : vector<64xf32> to vector<64x1xf32>
    %cst_1 = arith.constant 1.000000e-24 : f32
    %4 = vector.broadcast %cst_1 : f32 to vector<64x1xf32>
    %5 = arith.maximumf %3, %4 : vector<64x1xf32>
    %6 = math.rsqrt %5 : vector<64x1xf32>
    %cst_2 = arith.constant 1.500000e+00 : f32
    %7 = vector.broadcast %cst_2 : f32 to vector<64x1xf32>
    %8 = arith.mulf %7, %6 : vector<64x1xf32>
    %9 = vector.broadcast %8 : vector<64x1xf32> to vector<64x32xf32>
    %10 = arith.mulf %0, %9 : vector<64x32xf32>
    %c0_3 = arith.constant 0 : index
    %c0_4 = arith.constant 0 : index
    %11 = vector.load %arg2[%c0_3, %c0_4] : memref<64x32xf32, #tpu.memory_space<vmem>>, vector<64x32xf32>
    tpu.vector_store %arg2[%c0_3, %c0_4], %10 {strides = array<i32>} : memref<64x32xf32, #tpu.memory_space<vmem>>, vector<64x32xf32>,
    return
  }
  func.func @transform_0(%arg0: i32) -> (i32, i32) {
    %c0_i32 = arith.constant 0 : i32
    %c0_i32_0 = arith.constant 0 : i32
    return %arg0, %c0_i32 : i32, i32
  }
  func.func @transform_1(%arg0: i32) -> (i32, i32) {
    %c0_i32 = arith.constant 0 : i32
    %c0_i32_0 = arith.constant 0 : i32
    return %arg0, %c0_i32 : i32, i32
  }
}

</mosaic_0001>

<bundles_post_ra>
// kernel: tpu_custom_call.1
= control target key start
LH: loop header
LB: loop body
LE: loop exit
PB: predicated region body
PF: predicated region fallthrough
CT: control target
= control target key end

     0   :  { %vm24_vm0 = vcmask 261120   ;;  %s213_s0 = inlined_call_operand.vmem [shape: f32[64,32], index: 0, kind: input, shape index: {}]   ;;  %s214_s1 = inlined_call_operand.vmem [shape: f32[64,32], index: 1, kind: output, shape index: {}]  }
   0x1   :  { %v10_v0 = vld [vmem:[%s213_s0 + $0x10] sm:$0xff]  ;;  %v8_v1 = vld [vmem:[%s213_s0] sm:$0xff]  ;;  %v128_v2 = vld [vmem:[%s213_s0 + $0x18] sm:$0xff] }
   0x2   :  { %v18_v3 = vmul.f32 %v10_v0, %v10_v0  ;;  %v16_v4 = vmul.f32 %v8_v1, %v8_v1  ;;  %v19_v5 = vmul.f32 %v128_v2, %v128_v2  ;;  %v135_v6 = vld [vmem:[%s213_s0 + $0x8] sm:$0xff]  ;;  %v147_v9 = vld [vmem:[%s213_s0 + $0x20] sm:$0xff]  ;;  %v160_v16 = vld [vmem:[%s213_s0 + $0x38] sm:$0xff] }
   0x3   :  { %v17_v7 = vmul.f32 %v135_v6, %v135_v6  ;;  %v142_v8 = vld [vmem:[%s213_s0 + $0x28] sm:$0xff]  ;;  %v20_v15 = vmul.f32 %v147_v9, %v147_v9  ;;  %v165_v17 = vld [vmem:[%s213_s0 + $0x30] sm:$0xff]  ;;  %v23_v20 = vmul.f32 %v160_v16, %v160_v16 }
   0x4   :  { %v31_v10 = vsel %vm24_vm0, %v18_v3, 0.0  ;;  %v25_v11 = vsel %vm24_vm0, %v16_v4, 0.0  ;;  %v34_v12 = vsel %vm24_vm0, %v19_v5, 0.0  ;;  %v21_v14 = vmul.f32 %v142_v8, %v142_v8 }
   0x5   :  { %32 = vadd.xlane.f32.xlu1 %v31_v10  ;;  %26 = vadd.xlane.f32.xlu0 %v25_v11  ;;  %v28_v13 = vsel %vm24_vm0, %v17_v7, 0.0  ;;  %v37_v19 = vsel %vm24_vm0, %v20_v15, 0.0  ;;  %v22_v21 = vmul.f32 %v165_v17, %v165_v17  ;;  %v46_v22 = vsel %vm24_vm0, %v23_v20, 0.0 }
   0x6   :  { %v40_v18 = vsel %vm24_vm0, %v21_v14, 0.0 }
   0x7   :  { %v43_v23 = vsel %vm24_vm0, %v22_v21, 0.0 }
   0x9   :  { %35 = vadd.xlane.f32.xlu1 %v34_v12  ;;  %29 = vadd.xlane.f32.xlu0 %v28_v13 }
   0xd   :  { %41 = vadd.xlane.f32.xlu1 %v40_v18  ;;  %38 = vadd.xlane.f32.xlu0 %v37_v19 }
  0x11   :  { %47 = vadd.xlane.f32.xlu1 %v46_v22  ;;  %44 = vadd.xlane.f32.xlu0 %v43_v23 }
  0x8e   :  { %v33_v24 = vpop.xlane.xlu1 %32  ;;  %v27_v25 = vpop.xlane.xlu0 %26 }
  0x8f   :  { %v51_v26 = vmax.f32 %v33_v24, 1e-24  ;;  %v49_v27 = vmax.f32 %v27_v25, 1e-24 }
  0x91   :  { %93 = vrsqrt.f32 %v51_v26 }
  0x92   :  { %95 = vrsqrt.f32 %v49_v27  ;;  %v36_v28 = vpop.xlane.xlu1 %35  ;;  %v30_v29 = vpop.xlane.xlu0 %29 }
  0x93   :  { %v52_v30 = vmax.f32 %v36_v28, 1e-24  ;;  %v50_v31 = vmax.f32 %v30_v29, 1e-24 }
  0x95   :  { %97 = vrsqrt.f32 %v52_v30 }
  0x96   :  { %99 = vrsqrt.f32 %v50_v31  ;;  %v42_v32 = vpop.xlane.xlu1 %41  ;;  %v39_v33 = vpop.xlane.xlu0 %38 }
  0x97   :  { %v54_v34 = vmax.f32 %v42_v32, 1e-24  ;;  %v53_v35 = vmax.f32 %v39_v33, 1e-24 }
  0x99   :  { %101 = vrsqrt.f32 %v54_v34 }
  0x9a   :  { %103 = vrsqrt.f32 %v53_v35  ;;  %v48_v36 = vpop.xlane.xlu1 %47  ;;  %v45_v37 = vpop.xlane.xlu0 %44 }
  0x9b   :  { %v56_v38 = vmax.f32 %v48_v36, 1e-24  ;;  %v55_v39 = vmax.f32 %v45_v37, 1e-24 }
  0x9d   :  { %105 = vrsqrt.f32 %v56_v38 }
  0x9e   :  { %v94_v40 = vpop.eup %93  ;;  %107 = vrsqrt.f32 %v55_v39 }
  0x9f   :  { %v96_v41 = vpop.eup %95  ;;  %v67_v42 = vmul.f32 1.5, %v94_v40 }
  0xa0   :  { %v65_v43 = vmul.f32 1.5, %v96_v41 }
  0xa1   :  { %v75_v44 = vmul.f32 %v67_v42, %v10_v0 }
  0xa2   :  { %v98_v45 = vpop.eup %97  ;;  %v73_v46 = vmul.f32 %v65_v43, %v8_v1 }
  0xa3   :  { %v100_v47 = vpop.eup %99  ;;  %83 = vst.msk [vmem:[%s214_s1 + $0x10] sm:$0xff] %vm24_vm0, %v75_v44  ;;  %v68_v48 = vmul.f32 1.5, %v98_v45 }
  0xa4   :  { %81 = vst.msk [vmem:[%s214_s1] sm:$0xff] %vm24_vm0, %v73_v46  ;;  %v66_v49 = vmul.f32 1.5, %v100_v47 }
  0xa5   :  { %v76_v50 = vmul.f32 %v68_v48, %v128_v2 }
  0xa6   :  { %v102_v51 = vpop.eup %101  ;;  %v74_v52 = vmul.f32 %v66_v49, %v135_v6 }
  0xa7   :  { %v104_v53 = vpop.eup %103  ;;  %84 = vst.msk [vmem:[%s214_s1 + $0x18] sm:$0xff] %vm24_vm0, %v76_v50  ;;  %v70_v54 = vmul.f32 1.5, %v102_v51 }
  0xa8   :  { %82 = vst.msk [vmem:[%s214_s1 + $0x8] sm:$0xff] %vm24_vm0, %v74_v52  ;;  %v69_v55 = vmul.f32 1.5, %v104_v53 }
  0xa9   :  { %v78_v56 = vmul.f32 %v70_v54, %v142_v8 }
  0xaa   :  { %v106_v57 = vpop.eup %105  ;;  %v77_v58 = vmul.f32 %v69_v55, %v147_v9 }
  0xab   :  { %v108_v59 = vpop.eup %107  ;;  %86 = vst.msk [vmem:[%s214_s1 + $0x28] sm:$0xff] %vm24_vm0, %v78_v56  ;;  %v72_v60 = vmul.f32 1.5, %v106_v57 }
  0xac   :  { %85 = vst.msk [vmem:[%s214_s1 + $0x20] sm:$0xff] %vm24_vm0, %v77_v58  ;;  %v71_v61 = vmul.f32 1.5, %v108_v59 }
  0xad   :  { %v80_v62 = vmul.f32 %v72_v60, %v160_v16 }
  0xae   :  { %v79_v63 = vmul.f32 %v71_v61, %v165_v17 }
  0xaf   :  { %88 = vst.msk [vmem:[%s214_s1 + $0x38] sm:$0xff] %vm24_vm0, %v80_v62 }
  0xb0   :  { %87 = vst.msk [vmem:[%s214_s1 + $0x30] sm:$0xff] %vm24_vm0, %v79_v63 }

</bundles_post_ra>
